<compile_context>
chip_gen: v6e
topology: v6e:2x2x1
jax: 0.10.0
libtpu: 0.0.40
codegen_flags: <defaults>
</compile_context>

<pallas_src>
import jax
import jax.numpy as jnp
from jax.experimental import pallas as pl
from jax.experimental.pallas import tpu as pltpu

N, CIN, H, W = 2, 4, 16, 16        # batch, channels, spatial
COUT = 8                           # conv output channels
K = 3                              # conv kernel size (pad=1, stride=1 -> SAME)
NUM_CLASSES = 10                   # linear head
LANE = 128                         # lane-dense width for the classifier head
R = N * CIN                        # rows of the flattened input slab       (8)
HW = H * W                         # flattened spatial size (lanes)       (256)
NCOUT = N * COUT                   # conv-matmul M dim                     (16)
KK_NCIN = K * K * N * CIN          # conv-matmul K dim (im2col rows)       (72)
P_ROWS = 24                        # packed-params slab rows (multiple of 8)

# the w-coordinate mask uses `col & (W - 1)` — requires W to be a power of two
assert (W & (W - 1)) == 0, "W must be a power of two for the lane-coordinate mask"


def _wrapper_kernel(x_ref, p_ref, out_ref):
    """Fused normalize + conv3x3(SAME) + bias + ReLU + global-avg-pool + fc."""
    # ---- unpack the packed parameter slab (static VMEM slices) ----
    cw = p_ref[0:NCOUT, 0:KK_NCIN]                 # (16, 72) block-diag conv W (1/std folded)
    cb = p_ref[0:NCOUT, KK_NCIN:KK_NCIN + 1]       # (16, 1)  conv bias
    mean = p_ref[0:R, KK_NCIN + 1:KK_NCIN + 2]     # (8, 1)   per-(n,c) channel mean
    fw = p_ref[0:NCOUT, LANE:2 * LANE]             # (16,128) fc weights (1/HW folded)
    fb = p_ref[NCOUT:NCOUT + 1, LANE:2 * LANE]     # (1, 128) fc bias

    # ---- normalizer: subtract per-channel mean (1/std is folded into cw) ----
    xc = x_ref[...] - mean                         # (R, HW) = (8, 256)

    # ---- hoisted SAME-padding border masks (computed once, reused per tap) ----
    col = jax.lax.broadcasted_iota(jnp.int32, (R, HW), 1)
    w_pos = col & (W - 1)                          # w coordinate per lane
    h_m1 = w_pos >= 1                              # dx = -1 : source w-1 >= 0
    h_p1 = w_pos < (W - 1)                         # dx = +1 : source w+1 <  W
    v_m1 = col >= W                                # dy = -1 : source h-1 >= 0
    v_p1 = col < (H - 1) * W                       # dy = +1 : source h+1 <  H

    # ---- im2col: 9 taps = XLU lane-roll + border mask, stacked on sublanes ----
    taps = []
    for ky in range(K):
        for kx in range(K):
            dy, dx = ky - 1, kx - 1
            s = dy * W + dx                        # flat source offset
            # result[:, i] = xc[:, i + s]; wrapped lanes are zeroed by the masks
            shifted = xc if s == 0 else pltpu.roll(xc, shift=(-s) % HW, axis=1)
            hm = h_m1 if dx < 0 else (h_p1 if dx > 0 else None)
            vm = v_m1 if dy < 0 else (v_p1 if dy > 0 else None)
            mask = hm if vm is None else (vm if hm is None else (hm & vm))
            taps.append(shifted if mask is None else jnp.where(mask, shifted, 0.0))
    patches = jnp.concatenate(taps, axis=0)        # (K*K*R, HW) = (72, 256)

    # ---- conv as ONE MXU matmul over the whole batch (block-diag weights) ----
    acc = jnp.dot(cw, patches,
                  preferred_element_type=jnp.float32)    # (N*COUT, HW) = (16, 256)
    acc = jnp.maximum(acc + cb, 0.0)                     # bias + ReLU

    # ---- global-avg-pool (1/HW folded into fw) + linear head, single store ----
    pooled = jnp.sum(acc, axis=1, keepdims=True)         # (16, 1)
    prod = pooled * fw                                    # (16, 128)
    out_ref[...] = jnp.sum(prod.reshape(N, COUT, LANE), axis=1) + fb   # (2, 128)


def prepare_params(mean, std, conv_w_oihw, conv_b, fc_w, fc_b):
    """Precompute (once, outside the per-call path) the packed parameter slab."""
    f32 = jnp.float32
    # fold 1/std into the conv weights (exact: the mean is subtracted in-kernel
    # before the taps, so the SAME zero-padding of the normalized image commutes
    # with the per-channel scale).
    w_scaled = conv_w_oihw.astype(f32) * (1.0 / std.astype(f32))[None, :, None, None]
    # im2col rows are ordered tap-major then (batch, channel):
    #   row = (ky*K + kx) * (N*CIN) + n*CIN + c
    # block-diagonal over the batch so one matmul covers all N elements.
    w_tco = jnp.transpose(w_scaled, (2, 3, 1, 0)).reshape(K * K, CIN, COUT)   # [t, c, o]
    eye_n = jnp.eye(N, dtype=f32)
    cw = jnp.einsum("nm,tco->notmc", eye_n, w_tco).reshape(NCOUT, KK_NCIN)
    cb = jnp.tile(conv_b.astype(f32), N).reshape(NCOUT, 1)
    mean_rows = jnp.tile(mean.astype(f32), N).reshape(R, 1)

    # classifier head: pad to 128 lanes, tile per batch block, fold 1/HW pooling
    fw_pad = jnp.zeros((COUT, LANE), f32).at[:, :NUM_CLASSES].set(fc_w.astype(f32))
    fw = jnp.tile(fw_pad, (N, 1)) * (1.0 / HW)            # (N*COUT, LANE)
    fb = jnp.zeros((1, LANE), f32).at[:, :NUM_CLASSES].set(fc_b.astype(f32))

    p = jnp.zeros((P_ROWS, 2 * LANE), f32)
    p = p.at[0:NCOUT, 0:KK_NCIN].set(cw)
    p = p.at[0:NCOUT, KK_NCIN:KK_NCIN + 1].set(cb)
    p = p.at[0:R, KK_NCIN + 1:KK_NCIN + 2].set(mean_rows)
    p = p.at[0:NCOUT, LANE:2 * LANE].set(fw)
    p = p.at[NCOUT:NCOUT + 1, LANE:2 * LANE].set(fb)
    return p


@jax.jit
def model_wrapper_forward(x_nchw, params):
    """ModelWrapper.forward(x): normalize then run the model.  x is NCHW."""
    # lane-dense input slab: one flattened H*W image per (batch, channel) row
    x2 = x_nchw.astype(jnp.float32).reshape(R, HW)
    out = pl.pallas_call(
        _wrapper_kernel,
        out_shape=jax.ShapeDtypeStruct((N, LANE), jnp.float32),
    )(x2, params)
    return out[:, :NUM_CLASSES]


def _ref_forward(x_nchw, mean, std, conv_w, conv_b, fc_w, fc_b):
    """Pure-JAX reference matching the PyTorch semantics (NCHW)."""
    xn = (x_nchw - mean[None, :, None, None]) / std[None, :, None, None]
    y = jax.lax.conv_general_dilated(
        xn, conv_w, window_strides=(1, 1), padding="SAME",
        dimension_numbers=("NCHW", "OIHW", "NCHW"))
    y = y + conv_b[None, :, None, None]
    y = jnp.maximum(y, 0.0)
    pooled = jnp.mean(y, axis=(2, 3))
    return pooled @ fc_w + fc_b[None, :]


# TODO(synk): ModelWrapper.get_features(x, layer, before_relu) depends on the
# injected model's layer-introspection hook and is not implemented here.

if __name__ == "__main__":
    key = jax.random.PRNGKey(0)
    k_x, k_cw, k_cb, k_fw, k_fb = jax.random.split(key, 5)

    x = jax.random.normal(k_x, (N, CIN, H, W), jnp.float32)        # NCHW input
    mean = jnp.array([0.485, 0.456, 0.406, 0.5], jnp.float32)
    std = jnp.array([0.229, 0.224, 0.225, 0.25], jnp.float32)
    conv_w = 0.1 * jax.random.normal(k_cw, (COUT, CIN, K, K), jnp.float32)
    conv_b = 0.1 * jax.random.normal(k_cb, (COUT,), jnp.float32)
    fc_w = 0.1 * jax.random.normal(k_fw, (COUT, NUM_CLASSES), jnp.float32)
    fc_b = 0.1 * jax.random.normal(k_fb, (NUM_CLASSES,), jnp.float32)

    # hoisted: derived parameters are built once, not per forward call
    params = prepare_params(mean, std, conv_w, conv_b, fc_w, fc_b)

    out = model_wrapper_forward(x, params)
    out = jax.block_until_ready(out)

    ref = _ref_forward(x, mean, std, conv_w, conv_b, fc_w, fc_b)
    assert out.shape == (N, NUM_CLASSES)
    assert jnp.allclose(out, ref, rtol=1e-4, atol=1e-4), (out, ref)
    print("KERNEL_OK")
</pallas_src>

<mosaic_0001>
module attributes {stable_mosaic.version = 11 : i64} {
  func.func @_wrapper_kernel(%arg0: memref<8x256xf32, #tpu.memory_space<vmem>>, %arg1: memref<24x256xf32, #tpu.memory_space<vmem>>, %arg2: memref<2x128xf32, #tpu.memory_space<vmem>>) attributes {dimension_semantics = [], scalar_prefetch = 0 : i64, scratch_operands = 0 : i64, tpu.core_type = #tpu.core_type<tc>} {
    %c0 = arith.constant 0 : index
    %c0_0 = arith.constant 0 : index
    %0 = vector.load %arg1[%c0, %c0_0] : memref<24x256xf32, #tpu.memory_space<vmem>>, vector<16x72xf32>
    %c0_1 = arith.constant 0 : index
    %c72 = arith.constant 72 : index
    %1 = vector.load %arg1[%c0_1, %c72] : memref<24x256xf32, #tpu.memory_space<vmem>>, vector<16x1xf32>
    %c0_2 = arith.constant 0 : index
    %c73 = arith.constant 73 : index
    %2 = vector.load %arg1[%c0_2, %c73] : memref<24x256xf32, #tpu.memory_space<vmem>>, vector<8x1xf32>
    %c0_3 = arith.constant 0 : index
    %c128 = arith.constant 128 : index
    %3 = vector.load %arg1[%c0_3, %c128] : memref<24x256xf32, #tpu.memory_space<vmem>>, vector<16x128xf32>
    %c16 = arith.constant 16 : index
    %c128_4 = arith.constant 128 : index
    %4 = vector.load %arg1[%c16, %c128_4] : memref<24x256xf32, #tpu.memory_space<vmem>>, vector<1x128xf32>
    %c0_5 = arith.constant 0 : index
    %c0_6 = arith.constant 0 : index
    %5 = vector.load %arg0[%c0_5, %c0_6] : memref<8x256xf32, #tpu.memory_space<vmem>>, vector<8x256xf32>
    %6 = vector.broadcast %2 : vector<8x1xf32> to vector<8x256xf32>
    %7 = arith.subf %5, %6 : vector<8x256xf32>
    %8 = tpu.iota {dimensions = array<i32: 1>} : vector<8x256xi32>
    %c15_i32 = arith.constant 15 : i32
    %9 = vector.broadcast %c15_i32 : i32 to vector<8x256xi32>
    %10 = arith.andi %8, %9 : vector<8x256xi32>
    %c1_i32 = arith.constant 1 : i32
    %11 = vector.broadcast %c1_i32 : i32 to vector<8x256xi32>
    %12 = arith.cmpi sge, %10, %11 : vector<8x256xi32>
    %c15_i32_7 = arith.constant 15 : i32
    %13 = vector.broadcast %c15_i32_7 : i32 to vector<8x256xi32>
    %14 = arith.cmpi slt, %10, %13 : vector<8x256xi32>
    %c16_i32 = arith.constant 16 : i32
    %15 = vector.broadcast %c16_i32 : i32 to vector<8x256xi32>
    %16 = arith.cmpi sge, %8, %15 : vector<8x256xi32>
    %c240_i32 = arith.constant 240 : i32
    %17 = vector.broadcast %c240_i32 : i32 to vector<8x256xi32>
    %18 = arith.cmpi slt, %8, %17 : vector<8x256xi32>
    %c17_i32 = arith.constant 17 : i32
    %19 = tpu.dynamic_rotate %7 by %c17_i32 dim 1 : vector<8x256xf32>, i32 -> vector<8x256xf32>
    %20 = arith.andi %12, %16 : vector<8x256xi1>
    %cst = arith.constant 0.000000e+00 : f32
    %21 = vector.broadcast %cst : f32 to vector<8x256xf32>
    %22 = arith.select %20, %19, %21 : vector<8x256xi1>, vector<8x256xf32>
    %c16_i32_8 = arith.constant 16 : i32
    %23 = tpu.dynamic_rotate %7 by %c16_i32_8 dim 1 : vector<8x256xf32>, i32 -> vector<8x256xf32>
    %cst_9 = arith.constant 0.000000e+00 : f32
    %24 = vector.broadcast %cst_9 : f32 to vector<8x256xf32>
    %25 = arith.select %16, %23, %24 : vector<8x256xi1>, vector<8x256xf32>
    %c15_i32_10 = arith.constant 15 : i32
    %26 = tpu.dynamic_rotate %7 by %c15_i32_10 dim 1 : vector<8x256xf32>, i32 -> vector<8x256xf32>
    %27 = arith.andi %14, %16 : vector<8x256xi1>
    %cst_11 = arith.constant 0.000000e+00 : f32
    %28 = vector.broadcast %cst_11 : f32 to vector<8x256xf32>
    %29 = arith.select %27, %26, %28 : vector<8x256xi1>, vector<8x256xf32>
    %c1_i32_12 = arith.constant 1 : i32
    %30 = tpu.dynamic_rotate %7 by %c1_i32_12 dim 1 : vector<8x256xf32>, i32 -> vector<8x256xf32>
    %cst_13 = arith.constant 0.000000e+00 : f32
    %31 = vector.broadcast %cst_13 : f32 to vector<8x256xf32>
    %32 = arith.select %12, %30, %31 : vector<8x256xi1>, vector<8x256xf32>
    %c255_i32 = arith.constant 255 : i32
    %33 = tpu.dynamic_rotate %7 by %c255_i32 dim 1 : vector<8x256xf32>, i32 -> vector<8x256xf32>
    %cst_14 = arith.constant 0.000000e+00 : f32
    %34 = vector.broadcast %cst_14 : f32 to vector<8x256xf32>
    %35 = arith.select %14, %33, %34 : vector<8x256xi1>, vector<8x256xf32>
    %c241_i32 = arith.constant 241 : i32
    %36 = tpu.dynamic_rotate %7 by %c241_i32 dim 1 : vector<8x256xf32>, i32 -> vector<8x256xf32>
    %37 = arith.andi %12, %18 : vector<8x256xi1>
    %cst_15 = arith.constant 0.000000e+00 : f32
    %38 = vector.broadcast %cst_15 : f32 to vector<8x256xf32>
    %39 = arith.select %37, %36, %38 : vector<8x256xi1>, vector<8x256xf32>
    %c240_i32_16 = arith.constant 240 : i32
    %40 = tpu.dynamic_rotate %7 by %c240_i32_16 dim 1 : vector<8x256xf32>, i32 -> vector<8x256xf32>
    %cst_17 = arith.constant 0.000000e+00 : f32
    %41 = vector.broadcast %cst_17 : f32 to vector<8x256xf32>
    %42 = arith.select %18, %40, %41 : vector<8x256xi1>, vector<8x256xf32>
    %c239_i32 = arith.constant 239 : i32
    %43 = tpu.dynamic_rotate %7 by %c239_i32 dim 1 : vector<8x256xf32>, i32 -> vector<8x256xf32>
    %44 = arith.andi %14, %18 : vector<8x256xi1>
    %cst_18 = arith.constant 0.000000e+00 : f32
    %45 = vector.broadcast %cst_18 : f32 to vector<8x256xf32>
    %46 = arith.select %44, %43, %45 : vector<8x256xi1>, vector<8x256xf32>
    %47 = tpu.concatenate %22, %25, %29, %32, %7, %35, %39, %42, %46 in 0 : vector<8x256xf32>, vector<8x256xf32>, vector<8x256xf32>, vector<8x256xf32>, vector<8x256xf32>, vector<8x256xf32>, vector<8x256xf32>, vector<8x256xf32>, vector<8x256xf32> -> vector<72x256xf32>
    %cst_19 = arith.constant dense<0.000000e+00> : vector<16x256xf32>
    %48 = tpu.matmul %0, %47, %cst_19 {dimension_numbers = #tpu.dot_dimension_numbers<[1], [0], [0], [1], [0, 0, 1, 1], [], []>} : vector<16x72xf32>, vector<72x256xf32>, vector<16x256xf32> -> vector<16x256xf32>
    %49 = vector.broadcast %1 : vector<16x1xf32> to vector<16x256xf32>
    %50 = arith.addf %48, %49 : vector<16x256xf32>
    %cst_20 = arith.constant 0.000000e+00 : f32
    %51 = vector.broadcast %cst_20 : f32 to vector<16x256xf32>
    %52 = arith.maximumf %50, %51 : vector<16x256xf32>
    %cst_21 = arith.constant dense<0.000000e+00> : vector<16xf32>
    %53 = vector.multi_reduction <add>, %52, %cst_21 [1] : vector<16x256xf32> to vector<16xf32>
    %54 = vector.shape_cast %53 : vector<16xf32> to vector<16x1xf32>
    %55 = vector.broadcast %54 : vector<16x1xf32> to vector<16x128xf32>
    %56 = arith.mulf %55, %3 : vector<16x128xf32>
    %57 = vector.shape_cast %56 : vector<16x128xf32> to vector<2x8x128xf32>
    %cst_22 = arith.constant dense<0.000000e+00> : vector<2x128xf32>
    %58 = vector.multi_reduction <add>, %57, %cst_22 [1] : vector<2x8x128xf32> to vector<2x128xf32>
    %59 = vector.broadcast %4 : vector<1x128xf32> to vector<2x128xf32>
    %60 = arith.addf %58, %59 : vector<2x128xf32>
    %c0_23 = arith.constant 0 : index
    %c0_24 = arith.constant 0 : index
    %61 = vector.load %arg2[%c0_23, %c0_24] : memref<2x128xf32, #tpu.memory_space<vmem>>, vector<2x128xf32>
    tpu.vector_store %arg2[%c0_23, %c0_24], %60 {strides = array<i32>} : memref<2x128xf32, #tpu.memory_space<vmem>>, vector<2x128xf32>,
    return
  }
}

</mosaic_0001>

<bundles_post_ra>
// kernel: model_wrapper_forward.1
= control target key start
LH: loop header
LB: loop body
LE: loop exit
PB: predicated region body
PF: predicated region fallthrough
CT: control target
= control target key end

     0   :  { %v328_v1 = vmov 73   ;;  %s493_s0 = inlined_call_operand.vmem [shape: f32[8,256], index: 0, kind: input, shape index: {}]   ;;  %s494_s1 = inlined_call_operand.vmem [shape: f32[24,256], index: 1, kind: input, shape index: {}]   ;;  %s495_s2 = inlined_call_operand.hbm [shape: f32[2,128], index: 2, kind: output, shape index: {}]  }
   0x1   :  { %v358_v0 = vld [vmem:[%s494_s1] sm:$0xff]  ;;  %303 = vset.pattern.permute.xlu0 %v328_v1 }
   0x2   :  { %7 = vsyncpa [#allocation3], 0  ;;  %21 = vperm.xlu0 %303, %v358_v0   ;;  %v17_v2 = vld [vmem:[%s493_s0] sm:$0xff]  ;;  %v18_v3 = vld [vmem:[%s493_s0 + $0x8] sm:$0xff]  ;;  %s329_s15 = smov 111   ;;  %s330_s16 = smov 112   ;;  %v26_v10 = vlaneseq }
   0x3   :  { %s331_s17 = smov 113   ;;  %s332_s0 = smov 127   ;;  %v334_v7 = vmov 0.0   ;;  %v335_v8 = vmov 72   ;;  %v390_v9 = vld [vmem:[%s494_s1 + $0x10] sm:$0xff] }
   0x4   :  { %s333_s18 = smov 1   ;;  %197 = vmatprep.mubr.f32.mxu0 %v334_v7  ;;  %203 = vmatprep.mubr.f32.mxu1 %v334_v7  ;;  %s336_s19 = smov 15   ;;  %v394_v11 = vand.u32 127, %v26_v10 }
   0x5   :  { %304 = vset.pattern.permute.xlu1 %v335_v8  ;;  %s337_s20 = smov 16   ;;  %s338_s21 = smov 17  }
   0x6   :  { %305 = vset.pattern.permute.xlu0 %v335_v8  ;;  %v28_v12 = vadd.s32 128, %v394_v11  ;;  %v29_v15 = vand.u32 15, %v394_v11  ;;  %vm112_vm2 = vcmp.lt.s32.totalorder %v394_v11, 111  ;;  %vm103_vm5 = vcmp.lt.s32.totalorder %v394_v11, 112  ;;  %s339_s30 = smov [#allocation2]  }
   0x7   :  { %vm92_vm7 = vcmp.lt.s32.totalorder %v394_v11, 113  ;;  %vm83_vm10 = vcmp.lt.s32.totalorder %v394_v11, 127  ;;  %vm74_vm11 = vcmp.lt.s32.totalorder %v394_v11, 1  ;;  %vm35_vm12 = vcmp.ge.s32.totalorder %v394_v11, 16  ;;  %s249_s3 = sshll.u32 %s339_s30, 4  ;;  %s250_s3 = int_to_ptr.vmem [resolvable:$true] %s249_s3 }
   0x8   :  { %v30_v13 = vand.u32 15, %v28_v12  ;;  %vm38_vm1 = vcmp.lt.s32.totalorder %v28_v12, 240  ;;  %vm406_vm4 = vcmp.lt.s32.totalorder %v29_v15, 15  ;;  %vm425_vm9 = vcmp.ge.s32.totalorder %v29_v15, 1  ;;  %s306_s4 = scalar_lea.vmem %s250_s3, 32  ;;  %p311_p1 = scmp.lt.s32.totalorder %s250_s3, %s250_s3 }
   0x9   :  { %vm63_vm13 = vcmp.lt.s32.totalorder %v394_v11, 15  ;;  %vm66_vm14 = vmand %vm406_vm4, %vm35_vm12  ;;  %vm54_vm15 = vcmp.lt.s32.totalorder %v394_v11, 16  ;;  %p307_p0 = scmp.ne.s32.totalorder %s250_s3, %s306_s4  ;;  %p312_p2 = scmp.lt.s32.totalorder %s306_s4, %s306_s4 }
   0xa   :  { %vm397_vm0 = vcmp.lt.s32.totalorder %v30_v13, 15  ;;  %vm415_vm6 = vcmp.ge.s32.totalorder %v30_v13, 1 }
   0xb   :  { %vm116_vm3 = vmand %vm397_vm0, %vm38_vm1  ;;  %p313_p3 = por %p312_p2, %p311_p1 }
   0xc   :  { %vm96_vm8 = vmand %vm415_vm6, %vm38_vm1 }
   0xd   :  { %p314_p4 = pnand %p313_p3, %p307_p0 }
  0x7d   :  { %v22_v4 = vpop.permute.xlu0 %21 }
  0x7e   :  { %v367_v5 = vsub.f32 %v17_v2, %v22_v4  ;;  %v369_v6 = vsub.f32 %v18_v3, %v22_v4  ;;  %v14_v4 = vld [vmem:[%s494_s1 + $0x8] sm:$0xff] }
  0x80   :  { %110 = vrot.lane.b32.xlu1 %v369_v6, %s329_s15  ;;  %108 = vrot.lane.b32.xlu0 %v367_v5, %s329_s15 }
  0x84   :  { %99 = vrot.lane.b32.xlu1 %v367_v5, %s330_s16  ;;  %101 = vrot.lane.b32.xlu0 %v369_v6, %s330_s16 }
  0x88   :  { %88 = vrot.lane.b32.xlu1 %v367_v5, %s331_s17  ;;  %90 = vrot.lane.b32.xlu0 %v369_v6, %s331_s17 }
  0x8c   :  { %79 = vrot.lane.b32.xlu1 %v367_v5, %s332_s0  ;;  %81 = vrot.lane.b32.xlu0 %v369_v6, %s332_s0 }
  0x90   :  { %70 = vrot.lane.b32.xlu1 %v367_v5, %s333_s18  ;;  %72 = vrot.lane.b32.xlu0 %v369_v6, %s333_s18 }
  0x94   :  { %59 = vrot.lane.b32.xlu1 %v367_v5, %s336_s19  ;;  %61 = vrot.lane.b32.xlu0 %v369_v6, %s336_s19 }
  0x98   :  { %50 = vrot.lane.b32.xlu1 %v367_v5, %s337_s20  ;;  %52 = vrot.lane.b32.xlu0 %v369_v6, %s337_s20 }
  0x9c   :  { %39 = vrot.lane.b32.xlu1 %v367_v5, %s338_s21  ;;  %41 = vrot.lane.b32.xlu0 %v369_v6, %s338_s21 }
  0xa0   :  { %125 = vperm.xlu1 %304, %v390_v9   ;;  %120 = vperm.xlu0 %305, %v358_v0  }
  0xf2   :  { %v111_v16 = vpop.permute.xlu1 %110  ;;  %v109_v17 = vpop.permute.xlu0 %108 }
  0xf3   :  { %v114_v19 = vsel %vm112_vm2, %v111_v16, %v109_v17  ;;  %v113_v20 = vsel %vm112_vm2, %v109_v17, %v111_v16  ;;  %vm128_vm2 = vcmask 588800  }
  0xf4   :  { %257 = vmatprep.subr.msk.mxu0 %vm116_vm3, %v114_v19  ;;  %273 = vmatprep.subr.msk.mxu1 %vm116_vm3, %v114_v19  ;;  %v16_v19 = vld [vmem:[%s494_s1 + $0x28] ss:$0 sm:$0xff]  ;;  %vm239_vm3 = vcmask 1041409  }
  0xf5   :  { %258 = vmatpush1.msk.msra.mxu0 %vm406_vm4, %v113_v20  ;;  %282 = vmatpush1.msk.msra.mxu1 %vm406_vm4, %v113_v20 }
  0xf6   :  { %v100_v21 = vpop.permute.xlu1 %99  ;;  %v102_v22 = vpop.permute.xlu0 %101 }
  0xf7   :  { %v105_v24 = vsel %vm103_vm5, %v102_v22, %v100_v21  ;;  %v104_v25 = vsel %vm103_vm5, %v100_v21, %v102_v22 }
  0xf8   :  { %259 = vmatprep.subr.msk.mxu0 %vm38_vm1, %v105_v24  ;;  %274 = vmatprep.subr.msk.mxu1 %vm38_vm1, %v105_v24  ;;  %vm43_vm1 = vcmp.lt.s32.totalorder %v394_v11, 17 }
  0xf9   :  { %150 = vmatpush1.msra.mxu0 %v104_v25  ;;  %283 = vmatpush1.msra.mxu1 %v104_v25 }
  0xfa   :  { %v89_v26 = vpop.permute.xlu1 %88  ;;  %v91_v27 = vpop.permute.xlu0 %90 }
  0xfb   :  { %v93_v29 = vsel %vm92_vm7, %v89_v26, %v91_v27  ;;  %v94_v30 = vsel %vm92_vm7, %v91_v27, %v89_v26 }
  0xfc   :  { %260 = vmatprep.subr.msk.mxu0 %vm96_vm8, %v94_v30  ;;  %275 = vmatprep.subr.msk.mxu1 %vm96_vm8, %v94_v30 }
  0xfd   :  { %261 = vmatpush1.msk.msra.mxu0 %vm425_vm9, %v93_v29  ;;  %284 = vmatpush1.msk.msra.mxu1 %vm425_vm9, %v93_v29 }
  0xfe   :  { %v80_v31 = vpop.permute.xlu1 %79  ;;  %v82_v32 = vpop.permute.xlu0 %81 }
  0xff   :  { %v84_v33 = vsel %vm83_vm10, %v80_v31, %v82_v32  ;;  %v85_v34 = vsel %vm83_vm10, %v82_v32, %v80_v31 }
 0x100   :  { %262 = vmatprep.subr.msk.mxu0 %vm397_vm0, %v85_v34  ;;  %276 = vmatprep.subr.msk.mxu1 %vm397_vm0, %v85_v34 }
 0x101   :  { %263 = vmatpush1.msk.msra.mxu0 %vm406_vm4, %v84_v33  ;;  %285 = vmatpush1.msk.msra.mxu1 %vm406_vm4, %v84_v33 }
 0x102   :  { %v71_v35 = vpop.permute.xlu1 %70  ;;  %155 = vmatprep.subr.mxu0 %v369_v6  ;;  %277 = vmatprep.subr.mxu1 %v369_v6  ;;  %v73_v36 = vpop.permute.xlu0 %72 }
 0x103   :  { %v75_v37 = vsel %vm74_vm11, %v71_v35, %v73_v36  ;;  %v76_v38 = vsel %vm74_vm11, %v73_v36, %v71_v35  ;;  %156 = vmatpush1.msra.mxu0 %v367_v5  ;;  %286 = vmatpush1.msra.mxu1 %v367_v5 }
 0x104   :  { %264 = vmatprep.subr.msk.mxu0 %vm415_vm6, %v75_v37  ;;  %278 = vmatprep.subr.msk.mxu1 %vm415_vm6, %v75_v37 }
 0x105   :  { %265 = vmatpush1.msk.msra.mxu0 %vm425_vm9, %v76_v38  ;;  %287 = vmatpush1.msk.msra.mxu1 %vm425_vm9, %v76_v38 }
 0x106   :  { %v60_v39 = vpop.permute.xlu1 %59  ;;  %v62_v40 = vpop.permute.xlu0 %61 }
 0x107   :  { %v64_v41 = vsel %vm63_vm13, %v60_v39, %v62_v40  ;;  %v65_v42 = vsel %vm63_vm13, %v62_v40, %v60_v39 }
 0x108   :  { %266 = vmatprep.subr.msk.mxu0 %vm397_vm0, %v64_v41  ;;  %279 = vmatprep.subr.msk.mxu1 %vm397_vm0, %v64_v41  ;;  %vm46_vm0 = vmand %vm425_vm9, %vm35_vm12 }
 0x109   :  { %267 = vmatpush1.msk.msra.mxu0 %vm66_vm14, %v65_v42  ;;  %288 = vmatpush1.msk.msra.mxu1 %vm66_vm14, %v65_v42 }
 0x10a   :  { %v51_v43 = vpop.permute.xlu1 %50  ;;  %v53_v44 = vpop.permute.xlu0 %52 }
 0x10b   :  { %v56_v45 = vsel %vm54_vm15, %v53_v44, %v51_v43  ;;  %v55_v46 = vsel %vm54_vm15, %v51_v43, %v53_v44 }
 0x10c   :  { %161 = vmatprep.subr.mxu0 %v55_v46  ;;  %280 = vmatprep.subr.mxu1 %v55_v46 }
 0x10d   :  { %268 = vmatpush1.msk.msra.mxu0 %vm35_vm12, %v56_v45  ;;  %289 = vmatpush1.msk.msra.mxu1 %vm35_vm12, %v56_v45 }
 0x10e   :  { %v40_v47 = vpop.permute.xlu1 %39  ;;  %v42_v48 = vpop.permute.xlu0 %41 }
 0x10f   :  { %v44_v49 = vsel %vm43_vm1, %v40_v47, %v42_v48  ;;  %v45_v50 = vsel %vm43_vm1, %v42_v48, %v40_v47 }
 0x110   :  { %269 = vmatprep.subr.msk.mxu0 %vm415_vm6, %v44_v49  ;;  %281 = vmatprep.subr.msk.mxu1 %vm415_vm6, %v44_v49 }
 0x111   :  { %270 = vmatpush1.msk.msra.mxu0 %vm46_vm0, %v45_v50  ;;  %290 = vmatpush1.msk.msra.mxu1 %vm46_vm0, %v45_v50 }
 0x112   :  { %271 = vmatmul.mubr.msk.f32.vlgmr.msra.gmra.mxu0 %vm128_vm2, %v358_v0  ;;  %272 = vmatmul.mubr.msk.f32.vlgmr.msra.gmra.mxu1 %vm128_vm2, %v390_v9  ;;  %v15_v0 = vld [vmem:[%s494_s1 + $0x18] sm:$0xff] }
 0x11b   :  { %v126_v51 = vpop.permute.xlu1 %125  ;;  %v121_v52 = vpop.permute.xlu0 %120 }
 0x1d2   :  { %v199_v53 = vpop.f32.mrf.mxu0  ;;  %v205_v54 = vpop.f32.mrf.mxu1 }
 0x1d3   :  { %v206_v55 = vadd.f32 %v205_v54, %v126_v51  ;;  %v200_v56 = vadd.f32 %v199_v53, %v121_v52 }
 0x1d4   :  { %v201_v57 = vpop.f32.mrf.mxu0  ;;  %v207_v58 = vpop.f32.mrf.mxu1 }
 0x1d5   :  { %v208_v59 = vadd.f32 %v207_v58, %v126_v51  ;;  %v202_v60 = vadd.f32 %v201_v57, %v121_v52  ;;  %v210_v61 = vmax.f32 %v200_v56, 0.0  ;;  %v212_v62 = vmax.f32 %v206_v55, 0.0 }
 0x1d7   :  { %v213_v63 = vmax.f32 %v208_v59, 0.0  ;;  %v211_v1 = vmax.f32 %v202_v60, 0.0 }
 0x1d9   :  { %v217_v2 = vadd.f32 %v213_v63, %v212_v62  ;;  %v214_v3 = vadd.f32 %v211_v1, %v210_v61 }
 0x1db   :  { %218 = vadd.xlane.f32.xlu1 %v217_v2  ;;  %215 = vadd.xlane.f32.xlu0 %v214_v3 }
 0x264   :  { %v219_v5 = vpop.xlane.xlu1 %218  ;;  %v216_v6 = vpop.xlane.xlu0 %215 }
 0x265   :  { %v221_v7 = vmul.f32 %v219_v5, %v15_v0  ;;  %v220_v8 = vmul.f32 %v216_v6, %v14_v4 }
 0x267   :  { %v228_v9 = vrot.slane %v221_v7, 4  ;;  %v222_v10 = vrot.slane %v220_v8, 4 }
 0x269   :  { %v229_v11 = vadd.f32 %v228_v9, %v221_v7  ;;  %v223_v12 = vadd.f32 %v222_v10, %v220_v8 }
 0x26b   :  { %v230_v13 = vrot.slane %v229_v11, 2  ;;  %v224_v14 = vrot.slane %v223_v12, 2 }
 0x26d   :  { %v231_v15 = vadd.f32 %v230_v13, %v229_v11  ;;  %v225_v16 = vadd.f32 %v224_v14, %v223_v12 }
 0x26f   :  { %v232_v17 = vrot.slane %v231_v15, 1  ;;  %v226_v18 = vrot.slane %v225_v16, 1 }
 0x271   :  { %v233_v20 = vadd.f32 %v232_v17, %v231_v15  ;;  %v227_v21 = vadd.f32 %v226_v18, %v225_v16 }
 0x273   :  { %v235_v22 = vadd.f32 %v233_v20, %v16_v19  ;;  %v234_v23 = vadd.f32 %v227_v21, %v16_v19 }
 0x275   :  { %v238_v24 = vrot.slane %v235_v22, 7 }
 0x277   :  { %v240_v25 = vsel %vm239_vm3, %v238_v24, %v234_v23 }
 0x278   :  { %242 = vst [vmem:[#allocation2] sm:$0x3] %v240_v25 }
 0x279   :  { %317 = shalt.err (!%p314_p4)
}
 0x27a   :  { %252 = dma.vmem_to_hbm [thread:$0]  %s250_s3, 32, %s495_s2, [#allocation3]  }
 0x27b   :  { %326 = dma.done.wait [#allocation3], 32  }
 0x27c   :  { %327 = vsyncadd [#allocation3], 4294967264 }
 0x27d   :  { %256 = vsyncpa [#allocation3], 1 }

</bundles_post_ra>
